<compile_context>
chip_gen: v6e
topology: v6e:2x2x1
jax: 0.10.0
libtpu: 0.0.40
codegen_flags: <defaults>
</compile_context>

<pallas_src>
import math

import jax
import jax.numpy as jnp
from jax.experimental import pallas as pl
from jax.experimental.pallas import tpu as pltpu


# ---------------------------------------------------------------------------
# Small helpers
# ---------------------------------------------------------------------------
def _round_up(x, m):
    return (x + m - 1) // m * m


def _largest_divisor_leq(q, limit):
    """Largest divisor of q that is <= limit (>= 1)."""
    limit = max(1, min(q, limit))
    best, d = 1, 1
    while d * d <= q:
        if q % d == 0:
            if d <= limit:
                best = max(best, d)
            e = q // d
            if e <= limit:
                best = max(best, e)
        d += 1
    return best


def _pick_tile(dim, desired, gran):
    """Pick a tile that is a multiple of `gran`, divides round_up(dim, gran)
    exactly (so only granularity padding is ever needed), and is close to
    `desired`. Returns (tile, rounded_dim)."""
    dp = _round_up(dim, gran)
    q = dp // gran
    desired_units = max(1, desired // gran)
    if q <= 2 * desired_units:
        # Whole (rounded) dim fits comfortably as a single block.
        return dp, dp
    units = _largest_divisor_leq(q, desired_units)
    return units * gran, dp


def _device_config():
    """Generation-aware tiling preset / VMEM limit / fast-path threshold."""
    try:
        kind = jax.devices()[0].device_kind.lower()
    except Exception:  # pragma: no cover - defensive (AOT / mock compile)
        kind = ""
    if "v7" in kind:
        # 64 MiB VMEM per TC, 2 TCs/chip, 3.2 TB/s HBM: big tiles, keep headroom.
        return dict(tile=(512, 1024, 512), vmem=48 << 20, fast=8 << 20, cores=2)
    if "v6" in kind:
        # 128 MiB VMEM, 2x256^2 MXU: large tiles, raise the scoped limit.
        return dict(tile=(512, 1024, 512), vmem=100 << 20, fast=16 << 20, cores=1)
    if "v5" in kind:
        # Lowest HBM BW: big K tile keeps the MXU fed once bf16 shrinks the step.
        return dict(tile=(512, 1024, 512), vmem=100 << 20, fast=16 << 20, cores=1)
    return dict(tile=(512, 1024, 512), vmem=64 << 20, fast=8 << 20, cores=1)


# ---------------------------------------------------------------------------
# Kernels
# ---------------------------------------------------------------------------
def _orthfc_single_block_kernel(x_ref, w_ref, b_ref, o_ref):
    # Whole problem resident in VMEM: y = x @ W + b, one MXU pass, no pipeline.
    acc = jnp.dot(x_ref[...], w_ref[...], preferred_element_type=jnp.float32)
    o_ref[...] = (acc + b_ref[...].astype(jnp.float32)).astype(o_ref.dtype)


def _orthfc_tiled_kernel(x_ref, w_ref, b_ref, o_ref, acc_ref):
    k = pl.program_id(2)

    @pl.when(k == 0)
    def _():
        # Fold the bias into the accumulator init so the drain step on the last
        # K iteration is a pure cast + store (shorter critical tail).
        acc_ref[...] = jnp.broadcast_to(
            b_ref[...].astype(jnp.float32), acc_ref.shape
        )

    acc_ref[...] += jnp.dot(
        x_ref[...], w_ref[...], preferred_element_type=jnp.float32
    )

    @pl.when(k == pl.num_programs(2) - 1)
    def _():
        o_ref[...] = acc_ref[...].astype(o_ref.dtype)


# ---------------------------------------------------------------------------
# Forward
# ---------------------------------------------------------------------------
def orthfc_forward(x, w_eff, bias=None, *, tm=None, tn=None, tk=None,
                   compute_dtype="auto", force_tiled=False):
    """y = x @ w_eff + bias with a Pallas TPU kernel.

    x        : (M, K)
    w_eff    : (K, N) (semi-orthogonal)
    bias     : (N,) or None
    compute_dtype : "auto" (default) casts f32 operands to bf16 for the MXU
                    (accumulation stays f32). Pass jnp.float32 (or None) to
                    keep full-precision operands, or any other dtype to force.
    """
    M, K = x.shape
    Kw, N = w_eff.shape
    assert K == Kw, (K, Kw)
    out_dtype = x.dtype

    if bias is None:
        bias = jnp.zeros((N,), dtype=jnp.float32)
    bias2d = bias.reshape(1, N).astype(jnp.float32)

    # bf16 operands by default (MXU-native on all generations); f32 accumulation.
    if compute_dtype == "auto":
        compute_dtype = jnp.bfloat16 if x.dtype == jnp.float32 else None
    if compute_dtype is not None:
        x = x.astype(compute_dtype)
        w_eff = w_eff.astype(compute_dtype)

    cfg = _device_config()
    op_itemsize = jnp.dtype(x.dtype).itemsize
    out_itemsize = jnp.dtype(out_dtype).itemsize
    sub = 16 if op_itemsize == 2 else 8  # sublane granularity for the batch tile

    # ---- fast path: whole problem resident in VMEM, no grid, no pipeline ----
    resident_bytes = ((M * K + K * N) * op_itemsize
                      + M * N * out_itemsize + N * 4)
    if (not force_tiled) and resident_bytes <= cfg["fast"]:
        return pl.pallas_call(
            _orthfc_single_block_kernel,
            out_shape=jax.ShapeDtypeStruct((M, N), out_dtype),
            in_specs=[
                pl.BlockSpec(memory_space=pltpu.MemorySpace.VMEM),
                pl.BlockSpec(memory_space=pltpu.MemorySpace.VMEM),
                pl.BlockSpec(memory_space=pltpu.MemorySpace.VMEM),
            ],
            out_specs=pl.BlockSpec(memory_space=pltpu.MemorySpace.VMEM),
        )(x, w_eff, bias2d)

    # ---- tiled path ----
    tm_d, tk_d, tn_d = cfg["tile"]
    tm_want = tm if tm is not None else tm_d
    tk_want = tk if tk is not None else tk_d
    tn_want = tn if tn is not None else tn_d

    # Tiles divide the 8/16- and 128-rounded dims exactly -> only granularity
    # padding of operands (no full-tile padding copies of the activation).
    tm, Mp = _pick_tile(M, tm_want, sub)
    tk, Kp = _pick_tile(K, tk_want, 128)
    tn, Np = _pick_tile(N, tn_want, 128)

    # v7x megacore: make sure at least one parallel grid axis has >= 2 blocks
    # so the second TensorCore is not idle on small shapes.
    if cfg["cores"] > 1 and Mp // tm == 1 and Np // tn == 1:
        cands = []
        qm = Mp // sub
        if qm >= 2:
            um = _largest_divisor_leq(qm, qm // 2)
            cands.append((Mp // (um * sub), um * sub, "m"))
        qn = Np // 128
        if qn >= 2:
            un = _largest_divisor_leq(qn, qn // 2)
            cands.append((Np // (un * 128), un * 128, "n"))
        if cands:
            cands.sort(key=lambda c: (c[0], -c[1]))  # fewest blocks, largest tile
            _, t, ax = cands[0]
            if ax == "m":
                tm = t
            else:
                tn = t

    # Minimal (granularity-only) padding.
    if (Mp, Kp) != (M, K):
        x = jnp.pad(x, ((0, Mp - M), (0, Kp - K)))
    if (Kp, Np) != (K, N):
        w_eff = jnp.pad(w_eff, ((0, Kp - K), (0, Np - N)))
    if Np != N:
        bias2d = jnp.pad(bias2d, ((0, 0), (0, Np - N)))

    grid = (Mp // tm, Np // tn, Kp // tk)

    cost = pl.CostEstimate(
        flops=2 * Mp * Kp * Np,
        transcendentals=0,
        bytes_accessed=(Mp * Kp + Kp * Np) * op_itemsize
        + Mp * Np * out_itemsize + Np * 4,
    )

    # TODO(synk): on v5e, if a trace shows the K-loop weight DMA exposed, add
    # pipeline_mode=pl.Buffered(3) on the weight BlockSpec below.
    out = pl.pallas_call(
        _orthfc_tiled_kernel,
        out_shape=jax.ShapeDtypeStruct((Mp, Np), out_dtype),
        grid_spec=pltpu.PrefetchScalarGridSpec(
            num_scalar_prefetch=0,
            grid=grid,
            in_specs=[
                pl.BlockSpec((tm, tk), lambda i, j, k: (i, k)),
                pl.BlockSpec((tk, tn), lambda i, j, k: (k, j)),
                pl.BlockSpec((1, tn), lambda i, j, k: (0, j)),
            ],
            out_specs=pl.BlockSpec((tm, tn), lambda i, j, k: (i, j)),
            scratch_shapes=[pltpu.VMEM((tm, tn), jnp.float32)],
        ),
        compiler_params=pltpu.CompilerParams(
            dimension_semantics=("parallel", "parallel", "arbitrary"),
            vmem_limit_bytes=cfg["vmem"],
        ),
        cost_estimate=cost,
    )(x, w_eff, bias2d)

    if (Mp, Np) != (M, N):
        out = out[:M, :N]
    return out


# ---------------------------------------------------------------------------
# Parameter setup (the geotorch.orthogonal parametrization, in plain JAX)
# ---------------------------------------------------------------------------
def make_orthfc_params(key, dimin, dimout, bias=True):
    """Synthetic parameters matching ORTHFC.__init__; returns (w_eff, b) with
    w_eff of shape (dimin, dimout), semi-orthogonal (both PyTorch branches)."""
    kw, kb = jax.random.split(key)
    if dimin >= dimout:
        # newLinear: weight (dimin, dimout), orthonormal columns.
        a = jax.random.normal(kw, (dimin, dimout), dtype=jnp.float32)
        q, _ = jnp.linalg.qr(a)          # (dimin, dimout)
        w_eff = q
    else:
        # nn.Linear: weight (dimout, dimin) orthonormal; forward applies W.T.
        a = jax.random.normal(kw, (dimout, dimin), dtype=jnp.float32)
        q, _ = jnp.linalg.qr(a)          # (dimout, dimin)
        w_eff = q.T
    if bias:
        bound = 1.0 / math.sqrt(dimin)
        b = jax.random.uniform(
            kb, (dimout,), minval=-bound, maxval=bound, dtype=jnp.float32
        )
    else:
        b = jnp.zeros((dimout,), dtype=jnp.float32)
    return w_eff, b


if __name__ == "__main__":
    key = jax.random.PRNGKey(0)
    k1, k2, k3, k4, k5, k6 = jax.random.split(key, 6)

    # --- case 1: dimin >= dimout (newLinear branch) -> fast path, bf16 operands
    batch, dimin, dimout = 8, 256, 128
    x1 = jax.random.normal(k1, (batch, dimin), dtype=jnp.float32)
    w1, b1 = make_orthfc_params(k2, dimin, dimout, bias=True)
    y1 = jax.block_until_ready(orthfc_forward(x1, w1, b1))
    y1_ref = x1 @ w1 + b1
    assert y1.shape == (batch, dimout)
    assert float(jnp.max(jnp.abs(y1 - y1_ref))) < 5e-2

    # --- case 1b: same problem with the f32 opt-out (tight tolerance)
    y1f = jax.block_until_ready(orthfc_forward(x1, w1, b1, compute_dtype=jnp.float32))
    assert float(jnp.max(jnp.abs(y1f - y1_ref))) < 2e-3

    # --- case 2: dimin < dimout (nn.Linear branch), tiny -> fast path
    x2 = jax.random.normal(k3, (8, 96), dtype=jnp.float32)
    w2, b2 = make_orthfc_params(k4, 96, 160, bias=True)
    y2 = jax.block_until_ready(orthfc_forward(x2, w2, b2))
    y2_ref = x2 @ w2 + b2
    assert y2.shape == (8, 160)
    assert float(jnp.max(jnp.abs(y2 - y2_ref))) < 5e-2

    # --- case 3: non-tile-aligned dims, forced tiled path (granularity padding)
    M3, K3, N3 = 272, 900, 200
    x3 = jax.random.normal(k5, (M3, K3), dtype=jnp.float32)
    w3, b3 = make_orthfc_params(k6, K3, N3, bias=True)
    y3 = jax.block_until_ready(orthfc_forward(x3, w3, b3, force_tiled=True))
    y3_ref = x3 @ w3 + b3
    assert y3.shape == (M3, N3)
    assert float(jnp.max(jnp.abs(y3 - y3_ref))) < 5e-2

    # --- case 3b: forced tiled path with f32 operands (tight tolerance)
    y3f = jax.block_until_ready(
        orthfc_forward(x3, w3, b3, force_tiled=True, compute_dtype=jnp.float32))
    assert float(jnp.max(jnp.abs(y3f - y3_ref))) < 5e-3

    print("KERNEL_OK")
</pallas_src>

<mosaic_0001>
module attributes {stable_mosaic.version = 11 : i64} {
  func.func @_orthfc_single_block_kernel(%arg0: memref<8x256xbf16, #tpu.memory_space<vmem>>, %arg1: memref<256x128xbf16, #tpu.memory_space<vmem>>, %arg2: memref<1x128xf32, #tpu.memory_space<vmem>>, %arg3: memref<8x128xf32, #tpu.memory_space<vmem>>) attributes {dimension_semantics = [], scalar_prefetch = 0 : i64, scratch_operands = 0 : i64, tpu.core_type = #tpu.core_type<tc>} {
    %c0 = arith.constant 0 : index
    %c0_0 = arith.constant 0 : index
    %0 = vector.load %arg0[%c0, %c0_0] : memref<8x256xbf16, #tpu.memory_space<vmem>>, vector<8x256xbf16>
    %c0_1 = arith.constant 0 : index
    %c0_2 = arith.constant 0 : index
    %1 = vector.load %arg1[%c0_1, %c0_2] : memref<256x128xbf16, #tpu.memory_space<vmem>>, vector<256x128xbf16>
    %cst = arith.constant dense<0.000000e+00> : vector<8x128xf32>
    %2 = tpu.matmul %0, %1, %cst {dimension_numbers = #tpu.dot_dimension_numbers<[1], [0], [0], [1], [0, 0, 1, 1], [], []>} : vector<8x256xbf16>, vector<256x128xbf16>, vector<8x128xf32> -> vector<8x128xf32>
    %c0_3 = arith.constant 0 : index
    %c0_4 = arith.constant 0 : index
    %3 = vector.load %arg2[%c0_3, %c0_4] : memref<1x128xf32, #tpu.memory_space<vmem>>, vector<1x128xf32>
    %4 = vector.broadcast %3 : vector<1x128xf32> to vector<8x128xf32>
    %5 = arith.addf %2, %4 : vector<8x128xf32>
    %c0_5 = arith.constant 0 : index
    %c0_6 = arith.constant 0 : index
    %6 = vector.load %arg3[%c0_5, %c0_6] : memref<8x128xf32, #tpu.memory_space<vmem>>, vector<8x128xf32>
    tpu.vector_store %arg3[%c0_5, %c0_6], %5 {strides = array<i32>} : memref<8x128xf32, #tpu.memory_space<vmem>>, vector<8x128xf32>,
    return
  }
}

</mosaic_0001>

<bundles_post_ra>
// kernel: tpu_custom_call.1
= control target key start
LH: loop header
LB: loop body
LE: loop exit
PB: predicated region body
PF: predicated region fallthrough
CT: control target
= control target key end

     0   :  { %8 = vsyncpa [#allocation3], 0  ;;  %s409_s0 = inlined_call_operand.hbm [shape: bf16[8,256], index: 0, kind: input, shape index: {}]   ;;  %s410_s1 = inlined_call_operand.hbm [shape: bf16[256,128], index: 1, kind: input, shape index: {}]   ;;  %s411_s2 = inlined_call_operand.vmem [shape: f32[1,128], index: 2, kind: input, shape index: {}]   ;;  %s412_s3 = inlined_call_operand.hbm [shape: f32[8,128], index: 3, kind: output, shape index: {}]  }
   0x1   :  { %9 = vsyncpa [#allocation6], 0 }
   0x2   :  { %10 = vsyncpa [#allocation4], 0  ;;  %s372_s12 = smov [#allocation2]   ;;  %s373_s14 = smov [#allocation5]  }
   0x3   :  { %s17_s13 = sshll.u32 %s372_s12, 4  ;;  %s26_s15 = sshll.u32 %s373_s14, 4  ;;  %s18_s13 = int_to_ptr.vmem [resolvable:$true] %s17_s13  ;;  %s27_s15 = int_to_ptr.vmem [resolvable:$true] %s26_s15 }
   0x4   :  { %s314_s16 = scalar_lea.vmem %s18_s13, 128  ;;  %p319_p1 = scmp.lt.s32.totalorder %s18_s13, %s18_s13 }
   0x5   :  { %p315_p0 = scmp.ne.s32.totalorder %s18_s13, %s314_s16  ;;  %p320_p2 = scmp.lt.s32.totalorder %s314_s16, %s314_s16 }
   0x7   :  { %p321_p3 = por %p320_p2, %p319_p1 }
   0x9   :  { %p322_p4 = pnand %p321_p3, %p315_p0 }
   0xb   :  { %325 = shalt.err (!%p322_p4)
}
   0xc   :  { %20 = dma.hbm_to_vmem [thread:$0]  %s409_s0, 128, %s18_s13, [#allocation3]  }
   0xd   :  { %s334_s19 = scalar_lea.vmem %s27_s15, 2048  ;;  %p339_p6 = scmp.lt.s32.totalorder %s27_s15, %s27_s15 }
   0xe   :  { %p335_p5 = scmp.ne.s32.totalorder %s27_s15, %s334_s19  ;;  %p340_p7 = scmp.lt.s32.totalorder %s334_s19, %s334_s19 }
  0x10   :  { %p341_p8 = por %p340_p7, %p339_p6 }
  0x12   :  { %p342_p9 = pnand %p341_p8, %p335_p5 }
  0x14   :  { %345 = shalt.err (!%p342_p9)
}
  0x15   :  { %s374_s20 = smov 64   ;;  %s375_s21 = smov 4  }
  0x16   :  { %32 = dma.hbm_to_vmem [thread:$0]  %s410_s1, 2048, %s27_s15, [#allocation6], %s374_s20, %s374_s20, %s375_s21  }
  0x17   :  { %366 = dma.done.wait [#allocation3], 128  }
  0x18   :  { %367 = vsyncadd [#allocation3], 4294967168 }
  0x19   :  { %368 = dma.done.wait [#allocation6], 2048  }
  0x1a   :  { %369 = vsyncadd [#allocation6], 4294965248  ;;  %v288_v0 = vld [vmem:[#allocation5 + $0x78] sm:$0xff]   ;;  %v290_v2 = vld [vmem:[#allocation5 + $0x70] sm:$0xff]   ;;  %s376_s24 = smov [#allocation7]  }
  0x1b   :  { %v289_v1 = vld [vmem:[#allocation5 + $0x38] sm:$0xff]   ;;  %261 = vmatprep.subr.bf16.mxu0 %v288_v0  ;;  %v291_v3 = vld [vmem:[#allocation5 + $0x30] sm:$0xff]   ;;  %v292_v4 = vld [vmem:[#allocation5 + $0x68] sm:$0xff]   ;;  %s232_s25 = sshll.u32 %s376_s24, 4  ;;  %s233_s25 = int_to_ptr.vmem [resolvable:$true] %s232_s25 }
  0x1c   :  { %262 = vmatpush3.bf16.msra.mxu0 %v289_v1  ;;  %v293_v5 = vld [vmem:[#allocation5 + $0x28] sm:$0xff]   ;;  %v294_v6 = vld [vmem:[#allocation5 + $0x60] sm:$0xff]   ;;  %v296_v8 = vld [vmem:[#allocation5 + $0x58] sm:$0xff]   ;;  %s346_s26 = scalar_lea.vmem %s233_s25, 128  ;;  %p351_p11 = scmp.lt.s32.totalorder %s233_s25, %s233_s25 }
  0x1d   :  { %263 = vmatprep.subr.bf16.mxu0 %v290_v2  ;;  %v295_v7 = vld [vmem:[#allocation5 + $0x20] sm:$0xff]   ;;  %v297_v9 = vld [vmem:[#allocation5 + $0x18] sm:$0xff]   ;;  %v298_v10 = vld [vmem:[#allocation5 + $0x50] sm:$0xff]   ;;  %p347_p10 = scmp.ne.s32.totalorder %s233_s25, %s346_s26  ;;  %p352_p12 = scmp.lt.s32.totalorder %s346_s26, %s346_s26 }
  0x1e   :  { %v42_v11 = vld [vmem:[#allocation2] sm:$0xff]  ;;  %v299_v13 = vld [vmem:[#allocation5 + $0x10] sm:$0xff]   ;;  %v300_v14 = vld [vmem:[#allocation5 + $0x48] sm:$0xff]  }
  0x1f   :  { %v244_v12 = vcombine.high %v42_v11, %v42_v11  ;;  %v301_v15 = vld [vmem:[#allocation5 + $0x8] sm:$0xff]   ;;  %v302_v16 = vld [vmem:[#allocation5 + $0x40] sm:$0xff]   ;;  %v243_v18 = vcombine.low %v42_v11, %v42_v11  ;;  %v242_v20 = vld [vmem:[%s411_s2] ss:$0 sm:$0xff]  ;;  %p353_p13 = por %p352_p12, %p351_p11 }
  0x20   :  { %264 = vmatpush3.bf16.msra.mxu0 %v291_v3  ;;  %v303_v17 = vld [vmem:[#allocation5] sm:$0xff]  }
  0x21   :  { %265 = vmatprep.subr.bf16.mxu0 %v292_v4  ;;  %217 = vmatprep.mubr.bf16.mxu0 %v244_v12  ;;  %p354_p0 = pnand %p353_p13, %p347_p10 }
  0x24   :  { %266 = vmatpush3.bf16.msra.mxu0 %v293_v5 }
  0x25   :  { %267 = vmatprep.subr.bf16.mxu0 %v294_v6 }
  0x28   :  { %268 = vmatpush3.bf16.msra.mxu0 %v295_v7 }
  0x29   :  { %269 = vmatprep.subr.bf16.mxu0 %v296_v8 }
  0x2c   :  { %270 = vmatpush3.bf16.msra.mxu0 %v297_v9 }
  0x2d   :  { %271 = vmatprep.subr.bf16.mxu0 %v298_v10 }
  0x30   :  { %272 = vmatpush3.bf16.msra.mxu0 %v299_v13 }
  0x31   :  { %273 = vmatprep.subr.bf16.mxu0 %v300_v14 }
  0x34   :  { %274 = vmatpush3.bf16.msra.mxu0 %v301_v15 }
  0x35   :  { %275 = vmatprep.subr.bf16.mxu0 %v302_v16 }
  0x38   :  { %276 = vmatpush3.bf16.msra.mxu0 %v303_v17 }
  0x3b   :  { %218 = vmatmul.mubr.bf16.vlgmr.msra.gmra.mxu0 %v243_v18 }
  0xfb   :  { %v277_v19 = vpop.f32.mrf.mxu0 }
  0xfd   :  { %v278_v21 = vpop.f32.mrf.mxu0 }
  0xfe   :  { %v279_v22 = vadd.f32 %v278_v21, %v277_v19 }
  0xff   :  { %v280_v23 = vpop.f32.mrf.mxu0 }
 0x100   :  { %v220_v24 = vadd.f32 %v279_v22, %v242_v20 }
 0x101   :  { %v281_v25 = vpop.f32.mrf.mxu0 }
 0x102   :  { %225 = vst [vmem:[#allocation7] sm:$0xff] %v220_v24 }
 0x103   :  { %357 = shalt.err (!%p354_p0)
}
 0x104   :  { %235 = dma.vmem_to_hbm [thread:$0]  %s233_s25, 128, %s412_s3, [#allocation4]  }
 0x105   :  { %370 = dma.done.wait [#allocation4], 128  }
 0x106   :  { %371 = vsyncadd [#allocation4], 4294967168 }
 0x107   :  { %239 = vsyncpa [#allocation3], 1 }
 0x108   :  { %240 = vsyncpa [#allocation6], 1 }
 0x109   :  { %241 = vsyncpa [#allocation4], 1 }

</bundles_post_ra>
